<compile_context>
chip_gen: v6e
topology: v6e:2x2x1
jax: 0.10.0
libtpu: 0.0.40
codegen_flags: <defaults>
</compile_context>

<pallas_src>
import functools

import jax
import jax.numpy as jnp
from jax.experimental import pallas as pl
from jax.experimental.pallas import tpu as pltpu


def _round_up(n, m):
    return ((n + m - 1) // m) * m


def _bridge_kernel(x_ref, w_ref, b_ref, o_ref):
    # x_ref: [tb, in_p]  w_ref: [in_p, tn]  b_ref: [1, tn]  o_ref: [tb, tn]
    acc = jnp.dot(x_ref[...], w_ref[...], preferred_element_type=jnp.float32)
    acc = acc + b_ref[...]                            # broadcast over batch tile (f32)
    o_ref[...] = jnp.tanh(acc).astype(o_ref.dtype)    # tanh in f32 (v5e: no bf16 EUP)


@functools.partial(jax.jit, static_argnames=("out_dim",))
def bridge_forward(xs, ws, bs, *, out_dim):
    """tanh(xs[s] @ ws[s] + bs[s]) for every state s, in one Pallas call.

    xs: [S, B, in_dim] (unpadded)     ws: [S, in_p, out_p] (pre-padded)
    bs: [S, 1, out_p]  (pre-padded)   returns [S, B, out_dim]
    """
    S, B, in_dim = xs.shape
    _, in_p, out_p = ws.shape

    # ---- N (output-feature) tile. Multiples of 256 suit v6e/v7x's 2x256 MXU;
    # 128 is the floor (v5e's 128x128 MXU / lane width). Keep the
    # double-buffered weight tile under ~24 MiB so it fits v7x's 64 MiB VMEM.
    if out_p % 512 == 0:
        tn = 512
    elif out_p % 256 == 0:
        tn = 256
    else:
        tn = 128
    while tn > 128 and 8 * in_p * tn > 24 * 1024 * 1024 and out_p % (tn // 2) == 0:
        tn //= 2
    n_j = out_p // tn

    # ---- Batch tile: as large as fits (amortizes ~0.35us/step overhead, helps
    # most on v5e/v6e's 128 MiB VMEM) but chosen to minimize padding
    # (e.g. B=300 -> tb=304, not 512). Always a multiple of 8 sublanes.
    budget = 40 * 1024 * 1024                  # working-set budget (v7x headroom)
    w_bytes = 8 * (in_p * tn + tn)             # 2 buffers, f32: weight + bias tile
    per_row = 8 * (in_p + tn)                  # 2 buffers, f32: one x row + out row
    tb_max = 512
    if budget > w_bytes:
        tb_max = min(tb_max, max(8, ((budget - w_bytes) // per_row) // 8 * 8))
    else:
        tb_max = 8
    b8 = _round_up(B, 8)
    if b8 <= tb_max:
        tb = b8
    else:
        tb = _round_up(pl.cdiv(B, pl.cdiv(B, tb_max)), 8)
    b_p = _round_up(B, tb)
    n_bt = b_p // tb

    # ---- v7x has 2 TensorCores: if the grid collapsed to a single iteration,
    # split the N axis (when divisible) so both cores get work.
    if S * n_j * n_bt == 1 and out_p % 256 == 0:
        tn //= 2
        n_j = 2

    # Single pad for batch (-> b_p) and features (-> lane-aligned in_p matching
    # the pre-padded weights). allow_input_fusion below lets XLA fuse this pad
    # into the kernel's x operand instead of a separate HBM pass.
    pad_b, pad_f = b_p - B, in_p - in_dim
    if pad_b or pad_f:
        xs = jnp.pad(xs, ((0, 0), (0, pad_b), (0, pad_f)))

    # Per-step VMEM working set (all blocks double-buffered, f32), with 2x
    # headroom, capped below v7x's 64 MiB physical VMEM.
    block_bytes = 8 * (tb * in_p + in_p * tn + tn + tb * tn)
    vmem_limit = int(min(56 * 1024 * 1024, max(16 * 1024 * 1024, 2 * block_bytes)))

    cost = pl.CostEstimate(
        flops=2 * S * b_p * in_p * out_p,
        transcendentals=S * b_p * out_p,
        bytes_accessed=4 * S * (b_p * in_p + in_p * out_p + out_p + b_p * out_p),
    )

    out = pl.pallas_call(
        _bridge_kernel,
        out_shape=jax.ShapeDtypeStruct((S, b_p, out_p), xs.dtype),
        grid_spec=pltpu.PrefetchScalarGridSpec(
            num_scalar_prefetch=0,
            # bt innermost: weight/bias block index depends only on (s, j), so
            # the weight tile stays resident across batch tiles. No reduction
            # axis exists, so every axis is independent ("parallel").
            grid=(S, n_j, n_bt),
            in_specs=[
                pl.BlockSpec((None, tb, in_p), lambda s, j, bt: (s, bt, 0)),
                pl.BlockSpec((None, in_p, tn), lambda s, j, bt: (s, 0, j)),
                pl.BlockSpec((None, 1, tn), lambda s, j, bt: (s, 0, j)),
            ],
            out_specs=pl.BlockSpec((None, tb, tn), lambda s, j, bt: (s, bt, j)),
        ),
        compiler_params=pltpu.CompilerParams(
            dimension_semantics=("parallel", "parallel", "parallel"),
            vmem_limit_bytes=vmem_limit,
            allow_input_fusion=[True, False, False],
        ),
        cost_estimate=cost,
    )(xs, ws, bs)

    # Strip batch / lane padding (stores inside the kernel stay lane-dense).
    return out[:, :B, :out_dim]


class BridgeLayerPallas:
    """Pallas equivalent of mnmt/decoder/bridge.py::BridgeLayer.

    num_of_states == 1: takes a single [B, 2*enc_hidden] array (GRU path).
    num_of_states == 2: takes a tuple (h, c); both Linear+tanh transforms are
    computed by ONE fused pallas_call and returned as a tuple (LSTM path).
    """

    def __init__(self, encoder_hidden_dim, decoder_hidden_dim, num_of_states, key):
        self.num_of_states = num_of_states
        self.in_dim = encoder_hidden_dim * 2
        self.out_dim = decoder_hidden_dim
        in_p = _round_up(self.in_dim, 128)
        out_p = _round_up(self.out_dim, 128)

        # Deterministic init matching nn.Linear's U(-1/sqrt(in_dim), 1/sqrt(in_dim)).
        bound = 1.0 / float(self.in_dim) ** 0.5
        ws, bs = [], []
        for _ in range(num_of_states):
            kw, kb, key = jax.random.split(key, 3)
            # stored transposed: [in_dim, out_dim]
            w = jax.random.uniform(kw, (self.in_dim, self.out_dim), jnp.float32, -bound, bound)
            b = jax.random.uniform(kb, (self.out_dim,), jnp.float32, -bound, bound)
            ws.append(w)
            bs.append(b)
        # Unpadded copies kept for reference / inspection.
        self.weights = ws
        self.biases = bs
        # Pad + stack once at init so per-call work only touches x.
        self.w_stacked = jnp.stack(
            [jnp.pad(w, ((0, in_p - self.in_dim), (0, out_p - self.out_dim))) for w in ws]
        )  # [S, in_p, out_p]
        self.b_stacked = jnp.stack(
            [jnp.pad(b, (0, out_p - self.out_dim))[None, :] for b in bs]
        )  # [S, 1, out_p]

    def __call__(self, encoder_final_state):
        if self.num_of_states == 1:
            xs = encoder_final_state[None]          # [1, B, in_dim]
        else:
            xs = jnp.stack(encoder_final_state)     # [S, B, in_dim]
        out = bridge_forward(xs, self.w_stacked, self.b_stacked, out_dim=self.out_dim)
        if self.num_of_states == 1:
            return out[0]
        return tuple(out[s] for s in range(self.num_of_states))


def _ref_forward(x, w, b):
    return jnp.tanh(x @ w + b[None, :])


if __name__ == "__main__":
    key = jax.random.PRNGKey(0)
    k_params, k_h, k_c, k_x = jax.random.split(key, 4)

    batch = 2
    encoder_hidden_dim = 16     # in_dim = 32
    decoder_hidden_dim = 32
    in_dim = encoder_hidden_dim * 2

    # --- LSTM case: num_of_states == 2, tuple input -> one fused kernel ---
    bridge2 = BridgeLayerPallas(encoder_hidden_dim, decoder_hidden_dim, 2, k_params)
    h_in = jax.random.normal(k_h, (batch, in_dim), jnp.float32)
    c_in = jax.random.normal(k_c, (batch, in_dim), jnp.float32)
    h_out, c_out = bridge2((h_in, c_in))
    jax.block_until_ready((h_out, c_out))

    h_ref = _ref_forward(h_in, bridge2.weights[0], bridge2.biases[0])
    c_ref = _ref_forward(c_in, bridge2.weights[1], bridge2.biases[1])
    assert h_out.shape == (batch, decoder_hidden_dim)
    assert c_out.shape == (batch, decoder_hidden_dim)
    assert jnp.allclose(h_out, h_ref, atol=1e-5), "h mismatch"
    assert jnp.allclose(c_out, c_ref, atol=1e-5), "c mismatch"

    # --- GRU case: num_of_states == 1, single tensor input ---
    bridge1 = BridgeLayerPallas(encoder_hidden_dim, decoder_hidden_dim, 1, k_params)
    x_in = jax.random.normal(k_x, (batch, in_dim), jnp.float32)
    y_out = bridge1(x_in)
    jax.block_until_ready(y_out)
    y_ref = _ref_forward(x_in, bridge1.weights[0], bridge1.biases[0])
    assert y_out.shape == (batch, decoder_hidden_dim)
    assert jnp.allclose(y_out, y_ref, atol=1e-5), "single-state mismatch"

    print("KERNEL_OK")
</pallas_src>

<mosaic_0001>
module attributes {stable_mosaic.version = 11 : i64} {
  func.func @_bridge_kernel(%arg0: i32, %arg1: i32, %arg2: i32, %arg3: memref<1x8x128xf32, #tpu.memory_space<vmem>>, %arg4: memref<1x128x128xf32, #tpu.memory_space<vmem>>, %arg5: memref<1x1x128xf32, #tpu.memory_space<vmem>>, %arg6: memref<1x8x128xf32, #tpu.memory_space<vmem>>) attributes {dimension_semantics = [#tpu.dimension_semantics<parallel>, #tpu.dimension_semantics<parallel>, #tpu.dimension_semantics<parallel>], iteration_bounds = array<i64: 2, 1, 1>, scalar_prefetch = 0 : i64, scratch_operands = 0 : i64, tpu.core_type = #tpu.core_type<tc>, window_params = [{transform_indices = @transform_0, window_bounds = array<i64: 1, 8, 128>}, {transform_indices = @transform_1, window_bounds = array<i64: 1, 128, 128>}, {transform_indices = @transform_2, window_bounds = array<i64: 1, 1, 128>}, {transform_indices = @transform_3, window_bounds = array<i64: 1, 8, 128>}]} {
    %c0 = arith.constant 0 : index
    %c0_0 = arith.constant 0 : index
    %c0_1 = arith.constant 0 : index
    %0 = vector.load %arg3[%c0, %c0_0, %c0_1] : memref<1x8x128xf32, #tpu.memory_space<vmem>>, vector<1x8x128xf32>
    %1 = vector.shape_cast %0 : vector<1x8x128xf32> to vector<8x128xf32>
    %c0_2 = arith.constant 0 : index
    %c0_3 = arith.constant 0 : index
    %c0_4 = arith.constant 0 : index
    %2 = vector.load %arg4[%c0_2, %c0_3, %c0_4] : memref<1x128x128xf32, #tpu.memory_space<vmem>>, vector<1x128x128xf32>
    %3 = vector.shape_cast %2 : vector<1x128x128xf32> to vector<128x128xf32>
    %cst = arith.constant dense<0.000000e+00> : vector<8x128xf32>
    %4 = tpu.matmul %1, %3, %cst {dimension_numbers = #tpu.dot_dimension_numbers<[1], [0], [0], [1], [0, 0, 1, 1], [], []>} : vector<8x128xf32>, vector<128x128xf32>, vector<8x128xf32> -> vector<8x128xf32>
    %c0_5 = arith.constant 0 : index
    %c0_6 = arith.constant 0 : index
    %c0_7 = arith.constant 0 : index
    %5 = vector.load %arg5[%c0_5, %c0_6, %c0_7] : memref<1x1x128xf32, #tpu.memory_space<vmem>>, vector<1x1x128xf32>
    %6 = vector.shape_cast %5 : vector<1x1x128xf32> to vector<1x128xf32>
    %7 = vector.broadcast %6 : vector<1x128xf32> to vector<8x128xf32>
    %8 = arith.addf %4, %7 : vector<8x128xf32>
    %9 = math.tanh %8 : vector<8x128xf32>
    %c0_8 = arith.constant 0 : index
    %c0_9 = arith.constant 0 : index
    %c0_10 = arith.constant 0 : index
    %10 = vector.load %arg6[%c0_8, %c0_9, %c0_10] : memref<1x8x128xf32, #tpu.memory_space<vmem>>, vector<1x8x128xf32>
    %11 = vector.shape_cast %10 : vector<1x8x128xf32> to vector<8x128xf32>
    %12 = vector.shape_cast %9 : vector<8x128xf32> to vector<1x8x128xf32>
    tpu.vector_store %arg6[%c0_8, %c0_9, %c0_10], %12 {strides = array<i32>} : memref<1x8x128xf32, #tpu.memory_space<vmem>>, vector<1x8x128xf32>,
    return
  }
  func.func @transform_0(%arg0: i32, %arg1: i32, %arg2: i32) -> (i32, i32, i32) {
    %c0_i32 = arith.constant 0 : i32
    %c0_i32_0 = arith.constant 0 : i32
    return %arg0, %arg2, %c0_i32 : i32, i32, i32
  }
  func.func @transform_1(%arg0: i32, %arg1: i32, %arg2: i32) -> (i32, i32, i32) {
    %c0_i32 = arith.constant 0 : i32
    %c0_i32_0 = arith.constant 0 : i32
    return %arg0, %c0_i32, %arg1 : i32, i32, i32
  }
  func.func @transform_2(%arg0: i32, %arg1: i32, %arg2: i32) -> (i32, i32, i32) {
    %c0_i32 = arith.constant 0 : i32
    %c0_i32_0 = arith.constant 0 : i32
    return %arg0, %c0_i32, %arg1 : i32, i32, i32
  }
  func.func @transform_3(%arg0: i32, %arg1: i32, %arg2: i32) -> (i32, i32, i32) {
    %c0_i32 = arith.constant 0 : i32
    return %arg0, %arg2, %arg1 : i32, i32, i32
  }
}

</mosaic_0001>

<bundles_post_ra>
// kernel: bridge_forward.2
= control target key start
LH: loop header
LB: loop body
LE: loop exit
PB: predicated region body
PF: predicated region fallthrough
CT: control target
= control target key end

     0   :  { %s990_s0 = inlined_call_operand.hbm [shape: f32[2,128,128], index: 0, kind: input, shape index: {}]   ;;  %s991_s1 = inlined_call_operand.vmem [shape: f32[2,1,128], index: 1, kind: input, shape index: {}]   ;;  %s992_s2 = inlined_call_operand.hbm [shape: f32[2,2,32], index: 2, kind: input, shape index: {}]   ;;  %s993_s3 = inlined_call_operand.<no memory space> [shape: f32[], index: 3, kind: input, shape index: {}]   ;;  %s994_s4 = inlined_call_operand.vmem [shape: f32[2,8,128], index: 4, kind: output, shape index: {}]  }
   0x1   :  { %v9_v0 = vstv %s993_s3 }
   0x2   :  { %10 = vsyncpa [#allocation8], 0 }
   0x3   :  { %12 = vsyncpa [#allocation8 + $0x1], 0 }
   0x4   :  { %13 = vsyncpa [#allocation10], 0 }
   0x5   :  { %15 = vsyncpa [#allocation10 + $0x1], 0  ;;  %s830_s17 = smov 0   ;;  %s832_s18 = smov 0  }
   0x6   :  { %s834_s19 = smov 0   ;;  %s836_s20 = smov 0  }
   0x7   :  { %s838_s21 = smov 0   ;;  %s840_s22 = smov 0  }
   0x8 LB: > { %s549_s23 = sadd.s32 4294967295, %s794_s22   ;;  %s40_s24 = sadd.s32 1, %s790_s21  ;;  %s794_s22 = sphi %s840_s22, %s21_s22   ;;  %s790_s21 = sphi %s838_s21, %s1003_s21   ;;  %s786_s20 = sphi %s836_s20, %s1002_s20   ;;  %s782_s19 = sphi %s834_s19, %s1001_s19   ;;  %s778_s18 = sphi %s832_s18, %s1000_s18   ;;  %s774_s17 = sphi %s830_s17, %s999_s17  }
   0x9   : > { %p42_p0 = scmp.ge.s32.totalorder %s40_s24, 2  ;;  %s49_s25 = sadd.s32 1, %s782_s19 }
   0xa   : > { %p56_p1 = scmp.ne.s32.totalorder %s782_s19, %s778_s18  ;;  %p57_p2 = scmp.eq.s32.totalorder %s794_s22, 0 }
   0xb   : > { %s1005_s24 = smov (%p42_p0, %s40_s24), 0  ;;  %p62_p4 = scmp.ne.s32.totalorder %s778_s18, %s774_s17 }
   0xc   : > { %p866_p3 = por %p57_p2, %p56_p1  ;;  %s44_s27 = ssub.s32 %s790_s21, %s1005_s24 }
   0xd   : > { %p63_p5 = scmp.eq.s32.totalorder %s549_s23, 0  ;;  %p47_p6 = scmp.eq.s32.totalorder %s44_s27, 0 }
   0xe   : > { %p629_p8 = scmp.lt.s32.totalorder %s794_s22, 2  ;;  %s882_s30 = sand.u32 1, %s782_s19  }
   0xf   : > { %p873_p7 = por %p63_p5, %p62_p4  ;;  %s554_s5 = sshll.u32 %s790_s21, 5 }
  0x10   : > { %s879_s29 = scalar_select %p47_p6, %s782_s19, %s49_s25  }
  0x11   : > { %s553_s6 = sshll.u32 %s882_s30, 1  ;;  %s185_s9 = scalar_lea.hbm %s992_s2, %s554_s5 }
  0x12   : > { %s176_s10 = scalar_lea.vmem [#allocation7], %s553_s6  ;;  %p891_p9 = pnand %p629_p8, %p866_p3 }
  0x13   : > { %s187_s11 = sshll.u32 %s176_s10, 4  ;;  %p558_p10 = scmp.ge.s32.totalorder %s794_s22, 1  ;;  %s188_s11 = int_to_ptr.vmem [resolvable:$true] %s187_s11 }
  0x14   : > { %p223_p11 = scmp.lt.s32.totalorder %s794_s22, 3  ;;  %s173_s13 = scalar_lea.sflag [#allocation8], %s882_s30 }
  0x15   : > { %p686_p12 = pneg %p891_p9  ;;  %s697_s14 = scalar_lea.vmem %s188_s11, 32 }
  0x16   : > { %p698_p13 = scmp.ne.s32.totalorder %s188_s11, %s697_s14  ;;  %s796_s15 = smov [#allocation7]  }
  0x17   : > { %s702_s16 = sshll.u32 %s796_s15, 4  ;;  %s703_s16 = int_to_ptr.vmem [resolvable:$false] %s702_s16 }
  0x18   : > { %p700_p0 = pnand %p698_p13, %p686_p12  ;;  %s704_s17 = scalar_lea.vmem %s703_s16, 64 }
  0x19   : > { %p705_p2 = scmp.lt.s32.totalorder %s188_s11, %s703_s16  ;;  %p706_p3 = scmp.lt.s32.totalorder %s704_s17, %s697_s14 }
  0x1a   : > { %p701_p1 = pneg %p700_p0 }
  0x1b   : > { %p707_p4 = por %p706_p3, %p705_p2 }
  0x1d   : > { %p708_p5 = pnand %p707_p4, %p701_p1 }
  0x1f   : > { %711 = shalt.err (!%p708_p5)
}
  0x20   : > { %625 = dma.hbm_to_vmem [thread:$0]  (!%p891_p9), %s185_s9, 32, %s188_s11, %s173_s13  }
  0x21   : > { %p909_p6 = pnand %p558_p10, %p223_p11  ;;  %s555_s25 = sshll.u32 %s882_s30, 7 }
  0x22   : > { %s565_s26 = sshll.u32 %s790_s21, 11  ;;  %s198_s7 = scalar_lea.vmem [#allocation9], %s555_s25 }
  0x23   : > { %s205_s6 = scalar_lea.hbm %s990_s0, %s565_s26  ;;  %s206_s8 = sshll.u32 %s198_s7, 4  ;;  %s207_s8 = int_to_ptr.vmem [resolvable:$true] %s206_s8 }
  0x24   : > { %s195_s10 = scalar_lea.sflag [#allocation10], %s882_s30  ;;  %s725_s14 = scalar_lea.vmem %s207_s8, 2048 }
  0x25   : > { %p726_p8 = scmp.ne.s32.totalorder %s207_s8, %s725_s14  ;;  %s797_s9 = smov [#allocation9]  }
  0x26   : > { %s730_s11 = sshll.u32 %s797_s9, 4  ;;  %s731_s11 = int_to_ptr.vmem [resolvable:$false] %s730_s11 }
  0x27   : > { %p728_p13 = pnand %p726_p8, %p686_p12  ;;  %s732_s13 = scalar_lea.vmem %s731_s11, 4096 }
  0x28   : > { %p733_p10 = scmp.lt.s32.totalorder %s207_s8, %s731_s11  ;;  %p734_p11 = scmp.lt.s32.totalorder %s732_s13, %s725_s14 }
  0x29   : > { %p729_p0 = pneg %p728_p13 }
  0x2a   : > { %p735_p1 = por %p734_p11, %p733_p10 }
  0x2c   : > { %p736_p2 = pnand %p735_p1, %p729_p0 }
  0x2e   : > { %739 = shalt.err (!%p736_p2)
}
  0x2f   : > { %s798_s15 = smov 128   ;;  %s799_s16 = smov 8  }
  0x30   : > { %628 = dma.hbm_to_vmem [thread:$0]  (!%p891_p9), %s205_s6, 2048, %s207_s8, %s195_s10, %s798_s15, %s798_s15, %s799_s16  }
  0x31   : > { %227 = sbr.rel (%p909_p6) target bundleno = 301 (0x12d), region = 32  ;;  %s229_s30 = sand.u32 (!%p909_p6), 1, %s778_s18  }
  0x32   : > { %s559_s17 = sshll.u32 (!%p909_p6), %s229_s30, 1  ;;  %s230_s25 = scalar_lea.sflag (!%p909_p6), [#allocation8], %s229_s30 }
  0x33   : > { %s927_s26 = scalar_lea.vmem (!%p909_p6), [#allocation7], %s559_s17 }
  0x36   : > { %765 = dma.done.wait (%p873_p7), %s230_s25, 32  }
  0x37   : > { %767 = vsyncadd (%p873_p7), %s230_s25, 4294967264  ;;  %s560_s27 = sshll.u32 %s229_s30, 7  ;;  %s239_s5 = scalar_lea.sflag [#allocation10], %s229_s30 }
  0x38   : > { %s933_s12 = scalar_lea.vmem [#allocation9], %s560_s27 }
  0x39   : > { %769 = dma.done.wait (%p873_p7), %s239_s5, 2048  }
  0x3a   : > { %771 = vsyncadd (%p873_p7), %s239_s5, 4294965248  ;;  %v800_v1 = vmov 0.0   ;;  %vm801_vm0 = vmmov 0   ;;  %v335_v2 = vld [vmem:[%s933_s12 + $0x78] sm:$0xff]  ;;  %v334_v3 = vld [vmem:[%s933_s12 + $0x70] sm:$0xff]  ;;  %v305_v11 = vlaneseq  ;;  %p283_p7 = scmp.lt.s32.totalorder %s786_s20, 1 }
  0x3b   : > { %583 = vmatprep.subr.mxu0 %v800_v1  ;;  %615 = vmatprep.mubr.msk.f32.mxu0 %vm801_vm0, %v800_v1  ;;  %v333_v4 = vld [vmem:[%s933_s12 + $0x68] sm:$0xff]  ;;  %v332_v5 = vld [vmem:[%s933_s12 + $0x60] sm:$0xff]  ;;  %v331_v6 = vld [vmem:[%s933_s12 + $0x58] sm:$0xff] }
  0x3c   : > { %584 = vmatpush3.msra.mxu0 %v335_v2  ;;  %v330_v7 = vld [vmem:[%s933_s12 + $0x50] sm:$0xff]  ;;  %v329_v8 = vld [vmem:[%s933_s12 + $0x48] sm:$0xff]  ;;  %v328_v9 = vld [vmem:[%s933_s12 + $0x40] sm:$0xff]  ;;  %v306_v14 = vshrl.u32 %v305_v11, 7  ;;  %v312_v17 = vand.u32 127, %v305_v11  ;;  %s1007_s20 = smov (!%p283_p7, %s786_s20), 1 }
  0x3d   : > { %585 = vmatprep.subr.mxu0 %v800_v1  ;;  %v327_v10 = vld [vmem:[%s933_s12 + $0x38] sm:$0xff]  ;;  %v326_v12 = vld [vmem:[%s933_s12 + $0x30] sm:$0xff]  ;;  %v325_v13 = vld [vmem:[%s933_s12 + $0x28] sm:$0xff]  ;;  %s288_s14 = scalar_lea.vmem %s991_s1, %s1007_s20  ;;  %s561_s9 = sshll.u32 %s1007_s20, 3 }
  0x3e   : > { %586 = vmatpush3.msra.mxu0 %v334_v3  ;;  %v324_v15 = vld [vmem:[%s933_s12 + $0x20] sm:$0xff]  ;;  %v323_v16 = vld [vmem:[%s933_s12 + $0x18] sm:$0xff]  ;;  %vm309_vm1 = vcmp.lt.s32.totalorder %v306_v14, 2  ;;  %v322_v19 = vld [vmem:[%s933_s12 + $0x10] sm:$0xff]  ;;  %vm314_vm2 = vcmp.lt.s32.totalorder %v312_v17, 32  ;;  %s298_s15 = scalar_lea.vmem %s994_s4, %s561_s9 }
  0x3f   : > { %587 = vmatprep.subr.mxu0 %v800_v1  ;;  %v299_v18 = vld [vmem:[%s927_s26] sm:$0x3]  ;;  %v321_v20 = vld [vmem:[%s933_s12 + $0x8] sm:$0xff]  ;;  %v320_v22 = vld [vmem:[%s933_s12] sm:$0xff] }
  0x40   : > { %588 = vmatpush3.msra.mxu0 %v333_v4  ;;  %v310_v21 = vsel %vm309_vm1, %v299_v18, %v9_v0  ;;  %v562_v24 = vld [vmem:[%s288_s14] ss:$0 sm:$0xff] }
  0x41   : > { %589 = vmatprep.subr.mxu0 %v800_v1  ;;  %v315_v23 = vsel %vm314_vm2, %v310_v21, %v9_v0 }
  0x42   : > { %590 = vmatpush3.msra.mxu0 %v332_v5 }
  0x43   : > { %591 = vmatprep.subr.mxu0 %v800_v1 }
  0x44   : > { %592 = vmatpush3.msra.mxu0 %v331_v6 }
  0x45   : > { %593 = vmatprep.subr.mxu0 %v800_v1 }
  0x46   : > { %594 = vmatpush3.msra.mxu0 %v330_v7 }
  0x47   : > { %595 = vmatprep.subr.mxu0 %v800_v1 }
  0x48   : > { %596 = vmatpush3.msra.mxu0 %v329_v8 }
  0x49   : > { %597 = vmatprep.subr.mxu0 %v800_v1 }
  0x4a   : > { %598 = vmatpush3.msra.mxu0 %v328_v9 }
  0x4b   : > { %599 = vmatprep.subr.mxu0 %v800_v1 }
  0x4c   : > { %600 = vmatpush3.msra.mxu0 %v327_v10 }
  0x4d   : > { %601 = vmatprep.subr.mxu0 %v800_v1 }
  0x4e   : > { %602 = vmatpush3.msra.mxu0 %v326_v12 }
  0x4f   : > { %603 = vmatprep.subr.mxu0 %v800_v1 }
  0x50   : > { %604 = vmatpush3.msra.mxu0 %v325_v13 }
  0x51   : > { %605 = vmatprep.subr.mxu0 %v800_v1 }
  0x52   : > { %606 = vmatpush3.msra.mxu0 %v324_v15 }
  0x53   : > { %607 = vmatprep.subr.mxu0 %v800_v1 }
  0x54   : > { %608 = vmatpush3.msra.mxu0 %v323_v16 }
  0x55   : > { %609 = vmatprep.subr.mxu0 %v800_v1 }
  0x56   : > { %610 = vmatpush3.msra.mxu0 %v322_v19 }
  0x57   : > { %611 = vmatprep.subr.mxu0 %v800_v1 }
  0x58   : > { %612 = vmatpush3.msra.mxu0 %v321_v20 }
  0x59   : > { %613 = vmatprep.subr.mxu0 %v800_v1 }
  0x5a   : > { %614 = vmatpush3.msra.mxu0 %v320_v22 }
  0x5b   : > { %616 = vmatmul.mubr.f32.vlgmr.msra.gmra.mxu0 %v315_v23 }
 0x11b   : > { %v409_v25 = vpop.f32.mrf.mxu0 }
 0x11c   : > { %v410_v26 = vadd.f32 %v562_v24, %v409_v25 }
 0x11d   : > { %v617_v27 = vpop.f32.mrf.mxu0 }
 0x11e   : > { %682 = vtanh.f32 %v410_v26 }
 0x12b   : > { %v683_v28 = vpop.eup %682 }
 0x12c   : > { %414 = vst [vmem:[%s298_s15] sm:$0xff] %v683_v28 }
 0x12d PF: > { %s21_s22 = sadd.s32 1, %s794_s22   ;;  %s999_s17 = smov %s778_s18 }
 0x12e   : > { %p18_p9 = scmp.ge.s32.totalorder %s21_s22, 4   ;;  %s1000_s18 = smov %s782_s19 }
 0x12f   : > { %s1001_s19 = smov %s879_s29  ;;  %s1002_s20 = smov %s790_s21 }
 0x130   : > { %s1003_s21 = smov %s1005_s24  ;;  %20 = sbr.rel (!%p18_p9) target bundleno = 8 (0x8), region = 88 }
 0x135   :  { %446 = vsyncpa [#allocation8], 1 }
 0x136   :  { %448 = vsyncpa [#allocation8 + $0x1], 1 }
 0x137   :  { %449 = vsyncpa [#allocation10], 1 }
 0x138   :  { %451 = vsyncpa [#allocation10 + $0x1], 1 }

</bundles_post_ra>
